<compile_context>
chip_gen: v7x
topology: tpu7x:2x2x1
jax: 0.10.0
libtpu: 0.0.40
codegen_flags: <defaults>
</compile_context>

<pallas_src>
import functools

import jax
import jax.numpy as jnp
import numpy as np
from jax.experimental import pallas as pl
from jax.experimental.pallas import tpu as pltpu


def list_of_int_tuples(list_of_tuples):
    return [tuple(int(v) for v in t) for t in list_of_tuples]


def _round_up(n, m):
    return ((n + m - 1) // m) * m


def _largest_divisor(n, candidates):
    for c in candidates:
        if n % c == 0:
            return c
    return None


# ----------------------------- Pallas kernel ------------------------------ #
def _affine_kernel(x_ref, w_ref, b_ref, o_ref, acc_ref):
    """out[i,j] = sum_k x[i,k] @ w[k,j] + b[j]; f32 accumulation over K axis."""
    k = pl.program_id(2)

    @pl.when(k == 0)
    def _():
        acc_ref[...] = jnp.zeros_like(acc_ref)

    acc_ref[...] += jnp.dot(x_ref[...], w_ref[...],
                            preferred_element_type=jnp.float32)

    @pl.when(k == pl.num_programs(2) - 1)
    def _():
        o_ref[...] = (acc_ref[...] + b_ref[...].astype(jnp.float32)
                      ).astype(o_ref.dtype)


# Per-generation-safe budgets: sized so 2x-buffered tiles stay well inside
# v7x's 64 MiB physical VMEM (and v5e/v6e scoped limits with an explicit
# vmem_limit_bytes).
_RESIDENT_W_BYTES = 8 * 1024 * 1024    # keep whole fused weight resident if <=
_RESIDENT_X_TILE_BYTES = 2 * 1024 * 1024
_MAX_BM = 256


def _select_tiles(B, K, N, in_itemsize):
    # Sub-32-bit operands pack 2 rows per sublane -> prefer 16-multiples.
    gran = 16 if in_itemsize < 4 else 8

    # --- weight tiles ------------------------------------------------------
    w_bytes = K * N * in_itemsize
    if (w_bytes <= _RESIDENT_W_BYTES
            and K * in_itemsize * _MAX_BM <= _RESIDENT_X_TILE_BYTES):
        # Whole fused weight resident: constant block index -> W DMA'd once.
        tk, tn = K, N
    else:
        tn = _largest_divisor(N, (512, 384, 256, 128)) or N
        tk = _largest_divisor(K, (1024, 512, 256, 128)) or K
    n_tiles_n = N // tn

    # --- batch tile ---------------------------------------------------------
    if B > _MAX_BM:
        bm = _MAX_BM                              # cdiv grid; tail block masked
    elif n_tiles_n < 2 and B >= 2 * gran and B % (2 * gran) == 0:
        bm = B // 2                               # exact 2-way split (2 TCs)
    else:
        bm = B                                    # full-extent block, exact fit
    return bm, tk, tn


def _affine_pallas(x, w, b, out_dtype):
    """out = x @ w + b, tiled along batch / output features / contraction."""
    B, K = x.shape
    Kw, N = w.shape
    assert K == Kw, (K, Kw)
    in_itemsize = x.dtype.itemsize
    out_itemsize = jnp.dtype(out_dtype).itemsize

    bm, tk, tn = _select_tiles(B, K, N, in_itemsize)
    grid = (pl.cdiv(B, bm), N // tn, K // tk)

    # Advisory scheduling hint (worst case: W re-streamed once per batch tile).
    flops = 2 * B * K * N
    bytes_accessed = (B * K * in_itemsize
                      + grid[0] * K * N * in_itemsize
                      + B * N * out_itemsize
                      + N * 4)

    # Explicit VMEM budget for the chosen tiles (2x-buffered in/out + f32 acc).
    est = (2 * (bm * tk * in_itemsize + tk * tn * in_itemsize
                + tn * 4 + bm * tn * out_itemsize)
           + bm * tn * 4)
    vmem_limit = int(min(48 << 20, max(32 << 20, 2 * est)))

    return pl.pallas_call(
        _affine_kernel,
        out_shape=jax.ShapeDtypeStruct((B, N), out_dtype),
        grid_spec=pltpu.PrefetchScalarGridSpec(
            num_scalar_prefetch=0,
            grid=grid,
            in_specs=[
                pl.BlockSpec((bm, tk), lambda i, j, k: (i, k)),   # fused [x|c]
                pl.BlockSpec((tk, tn), lambda i, j, k: (k, j)),   # fused [W;Wc]
                pl.BlockSpec((1, tn), lambda i, j, k: (0, j)),    # bias (f32)
            ],
            out_specs=pl.BlockSpec((bm, tn), lambda i, j, k: (i, j)),
            scratch_shapes=[pltpu.VMEM((bm, tn), jnp.float32)],
        ),
        compiler_params=pltpu.CompilerParams(
            dimension_semantics=("parallel", "parallel", "arbitrary"),
            vmem_limit_bytes=vmem_limit,
        ),
        cost_estimate=pl.CostEstimate(
            flops=flops, transcendentals=0, bytes_accessed=bytes_accessed),
    )(x, w, b)


@functools.partial(jax.jit, static_argnames=("k_total", "compute_dtype"))
def _forward_jit(x, c, w, b, logdet, k_total, compute_dtype):
    """Concat/cast/zero-pad + Pallas affine + jacobian broadcast, all fused."""
    out_dtype = x.dtype
    cd = out_dtype if compute_dtype is None else jnp.dtype(compute_dtype)
    B = x.shape[0]

    parts = [x.astype(cd)]
    if c is not None:
        parts.append(c.astype(cd))
    cur = sum(p.shape[1] for p in parts)
    if cur < k_total:
        # Fused weight rows beyond (D+Dc) are zero, so zero-padding the input
        # columns (missing condition and/or 128-alignment) is exact.
        parts.append(jnp.zeros((B, k_total - cur), cd))
    xin = parts[0] if len(parts) == 1 else jnp.concatenate(parts, axis=1)

    out = _affine_pallas(xin, w, b, out_dtype)
    jac_vec = jnp.broadcast_to(logdet.astype(jnp.float32), (B,))
    return out, jac_vec


# ------------------------------ Module glue ------------------------------- #
class InvertibleModule:
    """JAX/Pallas realization of the FrEIA InvertibleModule contract."""

    def __init__(self, dims_in, dims_c=None, *, key=None, compute_dtype=None):
        if dims_c is None:
            dims_c = []
        self.dims_in = list_of_int_tuples(dims_in)
        self.dims_c = list_of_int_tuples(dims_c)
        (self.D,) = self.dims_in[0]
        self.Dc = self.dims_c[0][0] if self.dims_c else 0
        # compute_dtype=jnp.bfloat16 enables bf16 MXU operands (f32 accum);
        # default None keeps f32 so the invertibility tolerance holds.
        # NOTE: log|det J| is computed from the f32 W even when the applied
        # transform uses bf16-cast weights (documented small divergence).
        self.compute_dtype = (None if compute_dtype is None
                              else jnp.dtype(compute_dtype))

        key = jax.random.PRNGKey(0) if key is None else key
        k1, k2, k3 = jax.random.split(key, 3)
        # Deterministic, well-conditioned invertible weight.
        self.W = (jnp.eye(self.D, dtype=jnp.float32)
                  + 0.05 * jax.random.normal(k1, (self.D, self.D), jnp.float32))
        self.Wc = (0.1 * jax.random.normal(k2, (self.Dc, self.D), jnp.float32)
                   if self.Dc else None)
        self.b = 0.1 * jax.random.normal(k3, (1, self.D), jnp.float32)

        # ---- parameter-only derived quantities, cached once (not per call) ---
        # TODO(synk): slogdet / matrix inverse have no clean Pallas equivalent;
        # they are O(D^3) parameter-only ops, kept in plain XLA and cached here.
        _, self._logabsdet = jnp.linalg.slogdet(self.W)
        self._neg_logabsdet = -self._logabsdet
        self._winv = jnp.linalg.inv(self.W)
        self._b_fwd = self.b
        self._b_rev = -(self.b @ self._winv)

        # Fused weights so the kernel runs a single (K-tiled) matmul:
        #   fwd: [x|c|0] @ [W ; Wc ; 0] + b
        #   rev: [z|c|0] @ [Winv ; -(Wc Winv) ; 0] + (-b Winv)
        if self.Dc:
            w_fwd = jnp.concatenate([self.W, self.Wc], axis=0)
            w_rev = jnp.concatenate([self._winv, -(self.Wc @ self._winv)],
                                    axis=0)
        else:
            w_fwd = self.W
            w_rev = self._winv

        # Pad K = D + Dc up to a multiple of 128 once (dense MXU contraction,
        # no ragged lane loads); the missing-condition case is handled by
        # zero-padding the input columns, so no separate unfused weights.
        K = self.D + self.Dc
        self._Kp = _round_up(max(K, 1), 128)
        if self._Kp != K:
            w_fwd = jnp.pad(w_fwd, ((0, self._Kp - K), (0, 0)))
            w_rev = jnp.pad(w_rev, ((0, self._Kp - K), (0, 0)))

        # Pre-cast weights to the compute dtype ONCE (not per call); bias and
        # slogdet/inverse stay f32.
        if self.compute_dtype is not None:
            w_fwd = w_fwd.astype(self.compute_dtype)
            w_rev = w_rev.astype(self.compute_dtype)
        self._w_fwd = w_fwd
        self._w_rev = w_rev

    def output_dims(self, input_dims):
        return list_of_int_tuples(input_dims)

    def forward(self, x_or_z, c=None, rev=False, jac=True):
        (x,) = tuple(x_or_z)
        conds = list(c) if c is not None else []
        cond = conds[0] if (self.Dc > 0 and len(conds) > 0) else None

        w = self._w_rev if rev else self._w_fwd
        b = self._b_rev if rev else self._b_fwd
        j = self._neg_logabsdet if rev else self._logabsdet

        out, jac_vec = _forward_jit(
            x, cond, w, b, j,
            k_total=self._Kp,
            compute_dtype=(None if self.compute_dtype is None
                           else self.compute_dtype.name))
        return (out,), (jac_vec if jac else None)

    __call__ = forward


# --------------------------------- main ----------------------------------- #
if __name__ == "__main__":
    B, D, Dc = 16, 128, 32
    key = jax.random.PRNGKey(0)
    kx, kc, kp = jax.random.split(key, 3)
    x = jax.random.normal(kx, (B, D), jnp.float32)
    c = jax.random.normal(kc, (B, Dc), jnp.float32)

    module = InvertibleModule(dims_in=[(D,)], dims_c=[(Dc,)], key=kp)

    # Forward pass through the Pallas kernel.
    (z,), jac = module([x], [c], jac=True)
    z = jax.block_until_ready(z)
    jac = jax.block_until_ready(jac)

    # Reference check (plain JAX) for the forward affine.
    z_ref = x @ module.W + c @ module.Wc + module.b
    np.testing.assert_allclose(np.asarray(z), np.asarray(z_ref),
                               rtol=1e-5, atol=1e-4)

    # Invertibility contract: x_rev ~= x, jac_rev == -jac.
    (x_rev,), jac_rev = module([z], [c], rev=True, jac=True)
    x_rev = jax.block_until_ready(x_rev)
    np.testing.assert_allclose(np.asarray(x_rev), np.asarray(x),
                               rtol=1e-3, atol=1e-3)
    np.testing.assert_allclose(np.asarray(jac_rev), -np.asarray(jac),
                               rtol=1e-5, atol=1e-5)

    # Uneven batch (full-extent batch block path, no padding round-trip).
    (z2,), _ = module([x[:11]], [c[:11]], jac=False)
    z2 = jax.block_until_ready(z2)
    np.testing.assert_allclose(np.asarray(z2), np.asarray(z_ref[:11]),
                               rtol=1e-5, atol=1e-4)

    # No-condition call (zero-padded condition columns hit the zero weight rows).
    (z3,), _ = module([x], jac=False)
    z3 = jax.block_until_ready(z3)
    np.testing.assert_allclose(np.asarray(z3),
                               np.asarray(x @ module.W + module.b),
                               rtol=1e-5, atol=1e-4)

    print("KERNEL_OK")
</pallas_src>

<mosaic_0001>
module attributes {stable_mosaic.version = 11 : i64} {
  func.func @_affine_kernel(%arg0: i32, %arg1: i32, %arg2: i32, %arg3: memref<8x256xf32, #tpu.memory_space<vmem>>, %arg4: memref<256x128xf32, #tpu.memory_space<vmem>>, %arg5: memref<1x128xf32, #tpu.memory_space<vmem>>, %arg6: memref<8x128xf32, #tpu.memory_space<vmem>>, %arg7: memref<8x128xf32, #tpu.memory_space<vmem>>) attributes {dimension_semantics = [#tpu.dimension_semantics<parallel>, #tpu.dimension_semantics<parallel>, #tpu.dimension_semantics<arbitrary>], iteration_bounds = array<i64: 2, 1, 1>, scalar_prefetch = 0 : i64, scratch_operands = 1 : i64, tpu.core_type = #tpu.core_type<tc>, window_params = [{transform_indices = @transform_0, window_bounds = array<i64: 8, 256>}, {transform_indices = @transform_1, window_bounds = array<i64: 256, 128>}, {transform_indices = @transform_2, window_bounds = array<i64: 1, 128>}, {transform_indices = @transform_3, window_bounds = array<i64: 8, 128>}]} {
    %c0_i32 = arith.constant 0 : i32
    %0 = arith.cmpi eq, %arg2, %c0_i32 : i32
    %1 = arith.extui %0 : i1 to i32
    %c0_i32_0 = arith.constant 0 : i32
    %2 = arith.cmpi ne, %1, %c0_i32_0 : i32
    scf.if %2 {
      %cst_10 = arith.constant 0.000000e+00 : f32
      %12 = vector.broadcast %cst_10 : f32 to vector<8x128xf32>
      %c0_11 = arith.constant 0 : index
      %c0_12 = arith.constant 0 : index
      %13 = vector.load %arg7[%c0_11, %c0_12] : memref<8x128xf32, #tpu.memory_space<vmem>>, vector<8x128xf32>
      tpu.vector_store %arg7[%c0_11, %c0_12], %12 {strides = array<i32>} : memref<8x128xf32, #tpu.memory_space<vmem>>, vector<8x128xf32>,
    } else {
    }
    %c0 = arith.constant 0 : index
    %c0_1 = arith.constant 0 : index
    %3 = vector.load %arg7[%c0, %c0_1] : memref<8x128xf32, #tpu.memory_space<vmem>>, vector<8x128xf32>
    %c0_2 = arith.constant 0 : index
    %c0_3 = arith.constant 0 : index
    %4 = vector.load %arg3[%c0_2, %c0_3] : memref<8x256xf32, #tpu.memory_space<vmem>>, vector<8x256xf32>
    %c0_4 = arith.constant 0 : index
    %c0_5 = arith.constant 0 : index
    %5 = vector.load %arg4[%c0_4, %c0_5] : memref<256x128xf32, #tpu.memory_space<vmem>>, vector<256x128xf32>
    %cst = arith.constant dense<0.000000e+00> : vector<8x128xf32>
    %6 = tpu.matmul %4, %5, %cst {dimension_numbers = #tpu.dot_dimension_numbers<[1], [0], [0], [1], [0, 0, 1, 1], [], []>} : vector<8x256xf32>, vector<256x128xf32>, vector<8x128xf32> -> vector<8x128xf32>
    %7 = arith.addf %3, %6 : vector<8x128xf32>
    %c0_6 = arith.constant 0 : index
    %c0_7 = arith.constant 0 : index
    %8 = vector.load %arg7[%c0_6, %c0_7] : memref<8x128xf32, #tpu.memory_space<vmem>>, vector<8x128xf32>
    tpu.vector_store %arg7[%c0_6, %c0_7], %7 {strides = array<i32>} : memref<8x128xf32, #tpu.memory_space<vmem>>, vector<8x128xf32>,
    %c0_i32_8 = arith.constant 0 : i32
    %9 = arith.cmpi eq, %arg2, %c0_i32_8 : i32
    %10 = arith.extui %9 : i1 to i32
    %c0_i32_9 = arith.constant 0 : i32
    %11 = arith.cmpi ne, %10, %c0_i32_9 : i32
    scf.if %11 {
      %c0_10 = arith.constant 0 : index
      %c0_11 = arith.constant 0 : index
      %12 = vector.load %arg7[%c0_10, %c0_11] : memref<8x128xf32, #tpu.memory_space<vmem>>, vector<8x128xf32>
      %c0_12 = arith.constant 0 : index
      %c0_13 = arith.constant 0 : index
      %13 = vector.load %arg5[%c0_12, %c0_13] : memref<1x128xf32, #tpu.memory_space<vmem>>, vector<1x128xf32>
      %14 = vector.broadcast %13 : vector<1x128xf32> to vector<8x128xf32>
      %15 = arith.addf %12, %14 : vector<8x128xf32>
      %c0_14 = arith.constant 0 : index
      %c0_15 = arith.constant 0 : index
      %16 = vector.load %arg6[%c0_14, %c0_15] : memref<8x128xf32, #tpu.memory_space<vmem>>, vector<8x128xf32>
      tpu.vector_store %arg6[%c0_14, %c0_15], %15 {strides = array<i32>} : memref<8x128xf32, #tpu.memory_space<vmem>>, vector<8x128xf32>,
    } else {
    }
    return
  }
  func.func @transform_0(%arg0: i32, %arg1: i32, %arg2: i32) -> (i32, i32) {
    %c0_i32 = arith.constant 0 : i32
    return %arg0, %arg2 : i32, i32
  }
  func.func @transform_1(%arg0: i32, %arg1: i32, %arg2: i32) -> (i32, i32) {
    %c0_i32 = arith.constant 0 : i32
    return %arg2, %arg1 : i32, i32
  }
  func.func @transform_2(%arg0: i32, %arg1: i32, %arg2: i32) -> (i32, i32) {
    %c0_i32 = arith.constant 0 : i32
    %c0_i32_0 = arith.constant 0 : i32
    return %c0_i32, %arg1 : i32, i32
  }
  func.func @transform_3(%arg0: i32, %arg1: i32, %arg2: i32) -> (i32, i32) {
    %c0_i32 = arith.constant 0 : i32
    return %arg0, %arg1 : i32, i32
  }
}

</mosaic_0001>

<bundles_post_ra>
// kernel: _forward_jit.1
= control target key start
LH: loop header
LB: loop body
LE: loop exit
PB: predicated region body
PF: predicated region fallthrough
CT: control target
= control target key end

     0   :  { %8 = vsyncpa [#allocation4], 0  ;;  %s937_s0 = inlined_call_operand.vmem [shape: f32[16,256], index: 0, kind: input, shape index: {}]   ;;  %s938_s1 = inlined_call_operand.hbm [shape: f32[256,128], index: 1, kind: input, shape index: {}]   ;;  %s939_s2 = inlined_call_operand.vmem [shape: f32[1,128], index: 2, kind: input, shape index: {}]   ;;  %s940_s3 = inlined_call_operand.hbm [shape: f32[16,128], index: 3, kind: output, shape index: {}]  }
   0x1   :  { %9 = vsyncpa [#allocation5], 0 }
   0x2   :  { %11 = vsyncpa [#allocation5 + $0x1], 0  ;;  %s780_s12 = smov 0   ;;  %s782_s13 = smov 0  }
   0x3   :  { %s784_s14 = smov 0   ;;  %s786_s15 = smov 0  }
   0x4   :  { %s788_s16 = smov 0   ;;  %s790_s17 = smov 0  }
   0x5 LB: > { %s492_s18 = sadd.s32 4294967295, %s754_s17   ;;  %s493_s19 = sadd.s32 4294967294, %s754_s17   ;;  %s754_s17 = sphi %s790_s17, %s17_s17   ;;  %s750_s16 = sphi %s788_s16, %s958_s16   ;;  %s746_s15 = sphi %s786_s15, %s957_s15   ;;  %s742_s14 = sphi %s784_s14, %s956_s14   ;;  %s738_s13 = sphi %s782_s13, %s955_s13   ;;  %s734_s12 = sphi %s780_s12, %s954_s12  }
   0x6   : > { %s36_s20 = sadd.s32 1, %s750_s16  ;;  %s127_s21 = sadd.s32 1, %s742_s14 }
   0x7   : > { %p38_p0 = scmp.ge.s32.totalorder %s36_s20, 2  ;;  %p137_p1 = scmp.ne.s32.totalorder %s742_s14, %s738_s13 }
   0x8   : > { %p138_p2 = scmp.eq.s32.totalorder %s492_s18, 1  ;;  %p143_p3 = scmp.ne.s32.totalorder %s738_s13, %s734_s12 }
   0x9   : > { %s960_s20 = smov (%p38_p0, %s36_s20), 0  ;;  %p144_p5 = scmp.eq.s32.totalorder %s493_s19, 1 }
   0xa   : > { %p820_p4 = por %p138_p2, %p137_p1  ;;  %s122_s23 = ssub.s32 %s750_s16, %s960_s20 }
   0xb   : > { %p494_p6 = scmp.ge.s32.totalorder %s754_s17, 1  ;;  %p125_p7 = scmp.eq.s32.totalorder %s122_s23, 0 }
   0xc   : > { %s945_s22 = scalar_select %p820_p4, 1, 0 }
   0xd   : > { %p827_p8 = por %p144_p5, %p143_p3  ;;  %p151_p9 = scmp.lt.s32.totalorder %s754_s17, 3 }
   0xe   : > { %s833_s25 = scalar_select %p125_p7, %s742_s14, %s127_s21  }
   0xf   : > { %s946_s24 = scalar_select %p827_p8, 1, 0 }
  0x10   : > { %p835_p10 = pnand %p494_p6, %p151_p9  ;;  %p839_p11 = scmp.eq.s32.totalorder %s492_s18, 0 }
  0x11   : > { %s756_s28 = smov [#allocation3]   ;;  %s644_s6 = scalar_lea.hbm %s938_s1, 4096 }
  0x12   : > { %s947_s26 = scalar_select %p835_p10, 1, 0 }
  0x13   : > { %s948_s27 = scalar_select %p839_p11, 1, 0 }
  0x14   : > { %p582_p12 = pneg %p835_p10  ;;  %s167_s29 = sshll.u32 %s756_s28, 4  ;;  %s168_s29 = int_to_ptr.vmem [resolvable:$true] %s167_s29 }
  0x15   : > { %p645_p0 = scmp.ne.s32.totalorder %s938_s1, %s644_s6  ;;  %p651_p5 = scmp.lt.u32.totalorder %s644_s6, %s938_s1 }
  0x16   : > { %p847_p13 = pnand %p839_p11, %p582_p12 }
  0x18   : > { %p646_p1 = pneg %p847_p13 }
  0x1a   : > { %p647_p2 = pnand %p646_p1, %p645_p0 }
  0x1c   : > { %p648_p3 = pneg %p647_p2 }
  0x1e   : > { %p653_p6 = pnand %p651_p5, %p648_p3 }
  0x20   : > { %656 = shalt.err (!%p653_p6)
}
  0x21   : > { %s657_s11 = scalar_lea.vmem %s168_s29, 4096  ;;  %p665_p8 = scmp.lt.s32.totalorder %s168_s29, %s168_s29 }
  0x22   : > { %p658_p7 = scmp.ne.s32.totalorder %s168_s29, %s657_s11  ;;  %p666_p4 = scmp.lt.s32.totalorder %s657_s11, %s657_s11 }
  0x24   : > { %p660_p9 = pnand %p658_p7, %p646_p1  ;;  %p667_p11 = por %p666_p4, %p665_p8 }
  0x26   : > { %p661_p12 = pneg %p660_p9 }
  0x28   : > { %p668_p10 = pnand %p667_p11, %p661_p12 }
  0x2a   : > { %671 = shalt.err (!%p668_p10)
}
  0x2b   : > { %s757_s18 = smov 128   ;;  %s758_s19 = smov 8  }
  0x2c   : > { %585 = dma.hbm_to_vmem [thread:$0]  (!%p847_p13), %s938_s1, 4096, %s168_s29, [#allocation4], %s757_s18, %s757_s18, %s758_s19  }
  0x2d   : > { %p950_p0 = scmp.ne.s32.totalorder %s947_s26, 0 }
  0x2e   : > { %p951_p2 = scmp.ne.s32.totalorder (!%p950_p0), %s948_s27, 0 }
  0x2f   : > { %202 = sbr.rel (%p950_p0) target bundleno = 321 (0x141), region = 32 }
  0x36   : > { %725 = dma.done.wait (%p951_p2), [#allocation4], 4096  }
  0x37   : > { %727 = vsyncadd (%p951_p2), [#allocation4], 4294963200  ;;  %p234_p4 = scmp.lt.s32.totalorder %s746_s15, 1  ;;  %v271_v0 = vld [vmem:[#allocation3 + $0x80] sm:$0xff]  ;;  %v272_v1 = vld [vmem:[#allocation3 + $0x88] sm:$0xff]  ;;  %s230_s4 = sand.u32 1, %s738_s13  }
  0x38   : > { %v255_v2 = vld [vmem:[#allocation3] sm:$0xff]  ;;  %v544_v3 = vpack.c.bf16 %v272_v1, %v271_v0  ;;  %v256_v4 = vld [vmem:[#allocation3 + $0x8] sm:$0xff]  ;;  %v273_v5 = vld [vmem:[#allocation3 + $0x90] sm:$0xff]  ;;  %s500_s5 = sshll.u32 %s230_s4, 3  ;;  %s505_s8 = sshll.u32 %s746_s15, 7 }
  0x39   : > { %s235_s28 = scalar_select %p234_p4, %s746_s15, 1  ;;  %v274_v6 = vld [vmem:[#allocation3 + $0x98] sm:$0xff]  ;;  %v546_v7 = vpack.c.bf16 %v256_v4, %v255_v2  ;;  %v257_v9 = vld [vmem:[#allocation3 + $0x10] sm:$0xff]  ;;  %v275_v11 = vld [vmem:[#allocation3 + $0xa0] sm:$0xff] }
  0x3a   : > { %v548_v8 = vpack.c.bf16 %v274_v6, %v273_v5  ;;  %v258_v10 = vld [vmem:[#allocation3 + $0x18] sm:$0xff]  ;;  %545 = vmatprep.subr.bf16.mxu0 %v544_v3  ;;  %v276_v12 = vld [vmem:[#allocation3 + $0xa8] sm:$0xff]  ;;  %v259_v15 = vld [vmem:[#allocation3 + $0x20] sm:$0xff]  ;;  %s232_s9 = scalar_lea.vmem [#allocation6], %s500_s5  ;;  %s890_s19 = scalar_lea.hbm %s940_s3, %s505_s8 }
  0x3b   : > { %547 = vmatpush3.bf16.msra.mxu0 %v546_v7  ;;  %v550_v13 = vpack.c.bf16 %v258_v10, %v257_v9  ;;  %s508_s26 = sshll.u32 %s235_s28, 4  ;;  %v552_v14 = vpack.c.bf16 %v276_v12, %v275_v11  ;;  %v260_v16 = vld [vmem:[#allocation3 + $0x28] sm:$0xff]  ;;  %v277_v17 = vld [vmem:[#allocation3 + $0xb0] sm:$0xff]  ;;  %v278_v18 = vld [vmem:[#allocation3 + $0xb8] sm:$0xff]  ;;  %s387_s10 = sshll.u32 %s232_s9, 4  ;;  %s892_s10 = int_to_ptr.vmem [resolvable:$true] %s387_s10 }
  0x3c   : > { %549 = vmatprep.subr.bf16.mxu0 %v548_v8  ;;  %s878_s30 = scalar_lea.vmem %s937_s0, %s508_s26  ;;  %v554_v19 = vpack.c.bf16 %v260_v16, %v259_v15  ;;  %v556_v20 = vpack.c.bf16 %v278_v18, %v277_v17  ;;  %v261_v21 = vld [vmem:[#allocation3 + $0x30] sm:$0xff]  ;;  %v262_v22 = vld [vmem:[#allocation3 + $0x38] sm:$0xff]  ;;  %v279_v23 = vld [vmem:[#allocation3 + $0xc0] sm:$0xff]  ;;  %s373_s21 = scalar_lea.sflag [#allocation5], %s230_s4 }
  0x3d   : > { %v280_v24 = vld [vmem:[#allocation3 + $0xc8] sm:$0xff]  ;;  %v558_v26 = vpack.c.bf16 %v262_v22, %v261_v21  ;;  %v263_v28 = vld [vmem:[#allocation3 + $0x40] sm:$0xff]  ;;  %v281_v30 = vld [vmem:[#allocation3 + $0xd0] sm:$0xff]  ;;  %s672_s23 = scalar_lea.vmem %s892_s10, 128  ;;  %p952_p10 = scmp.ne.s32.totalorder %s945_s22, 0 }
  0x3e   : > { %v254_v25 = vld [vmem:[%s878_s30 + $0x8] sm:$0xff]  ;;  %v560_v27 = vpack.c.bf16 %v280_v24, %v279_v23  ;;  %v282_v31 = vld [vmem:[#allocation3 + $0xd8] sm:$0xff]  ;;  %v265_v34 = vld [vmem:[#allocation3 + $0x50] sm:$0xff]  ;;  %p673_p8 = scmp.ne.s32.totalorder %s892_s10, %s672_s23  ;;  %s759_s15 = smov [#allocation6]  }
  0x3f   : > { %551 = vmatpush3.bf16.msra.mxu0 %v550_v13  ;;  %351 = vmatprep.mubr.f32.mxu0 %v254_v25  ;;  %v264_v29 = vld [vmem:[#allocation3 + $0x48] sm:$0xff]  ;;  %v564_v33 = vpack.c.bf16 %v282_v31, %v281_v30  ;;  %v266_v35 = vld [vmem:[#allocation3 + $0x58] sm:$0xff]  ;;  %v283_v36 = vld [vmem:[#allocation3 + $0xe0] sm:$0xff]  ;;  %s676_s28 = sshll.u32 %s759_s15, 4  ;;  %s677_s28 = int_to_ptr.vmem [resolvable:$false] %s676_s28 }
  0x40   : > { %553 = vmatprep.subr.bf16.mxu0 %v552_v14  ;;  %v562_v32 = vpack.c.bf16 %v264_v29, %v263_v28  ;;  %v284_v37 = vld [vmem:[#allocation3 + $0xe8] sm:$0xff]  ;;  %v566_v38 = vpack.c.bf16 %v266_v35, %v265_v34  ;;  %v267_v40 = vld [vmem:[#allocation3 + $0x60] sm:$0xff]  ;;  %v285_v42 = vld [vmem:[#allocation3 + $0xf0] sm:$0xff]  ;;  %p674_p11 = pnand %p673_p8, %p952_p10  ;;  %s678_s26 = scalar_lea.vmem %s677_s28, 256 }
  0x41   : > { %v568_v39 = vpack.c.bf16 %v284_v37, %v283_v36  ;;  %v268_v41 = vld [vmem:[#allocation3 + $0x68] sm:$0xff]  ;;  %v286_v43 = vld [vmem:[#allocation3 + $0xf8] sm:$0xff]  ;;  %v269_v46 = vld [vmem:[#allocation3 + $0x70] sm:$0xff]  ;;  %p679_p1 = scmp.lt.s32.totalorder %s892_s10, %s677_s28  ;;  %p680_p3 = scmp.lt.s32.totalorder %s678_s26, %s672_s23 }
  0x42   : > { %v570_v44 = vpack.c.bf16 %v268_v41, %v267_v40  ;;  %v572_v45 = vpack.c.bf16 %v286_v43, %v285_v42  ;;  %v270_v47 = vld [vmem:[#allocation3 + $0x78] sm:$0xff]  ;;  %v253_v49 = vld [vmem:[%s878_s30] sm:$0xff]  ;;  %p675_p13 = pneg %p674_p11 }
  0x43   : > { %555 = vmatpush3.bf16.msra.mxu0 %v554_v19  ;;  %v574_v48 = vpack.c.bf16 %v270_v47, %v269_v46  ;;  %v503_v52 = vld [vmem:[%s939_s2] ss:$0 sm:$0xff]  ;;  %p681_p5 = por %p680_p3, %p679_p1 }
  0x44   : > { %557 = vmatprep.subr.bf16.mxu0 %v556_v20 }
  0x45   : > { %p682_p6 = pnand %p681_p5, %p675_p13 }
  0x47   : > { %559 = vmatpush3.bf16.msra.mxu0 %v558_v26 }
  0x48   : > { %561 = vmatprep.subr.bf16.mxu0 %v560_v27 }
  0x4b   : > { %563 = vmatpush3.bf16.msra.mxu0 %v562_v32 }
  0x4c   : > { %565 = vmatprep.subr.bf16.mxu0 %v564_v33 }
  0x4f   : > { %567 = vmatpush3.bf16.msra.mxu0 %v566_v38 }
  0x50   : > { %569 = vmatprep.subr.bf16.mxu0 %v568_v39 }
  0x53   : > { %571 = vmatpush3.bf16.msra.mxu0 %v570_v44 }
  0x54   : > { %573 = vmatprep.subr.bf16.mxu0 %v572_v45 }
  0x57   : > { %575 = vmatpush3.bf16.msra.mxu0 %v574_v48 }
  0x5a   : > { %352 = vmatmul.mubr.f32.vlgmr.msra.gmra.mrb[0].mxu0 %v253_v49 }
 0x12d   : > { %v541_v50 = vpop.f32.mrb[0].mxu0 }
 0x12e   : > { %v542_v51 = vpop.f32.mrb[1].mxu0 }
 0x12f   : > { %v543_v53 = vadd.f32 %v542_v51, %v541_v50 }
 0x131   : > { %v370_v54 = vadd.f32 %v543_v53, %v503_v52 }
 0x133   : > { %371 = vst [vmem:[%s232_s9] sm:$0xff] %v370_v54 }
 0x134   : > { %685 = shalt.err (!%p682_p6)
}
 0x135   : > { %s686_s27 = scalar_lea.hbm %s890_s19, 128  ;;  %s690_s4 = scalar_lea.hbm %s940_s3, 256 }
 0x136   : > { %p687_p7 = scmp.ne.s32.totalorder %s890_s19, %s686_s27  ;;  %p691_p0 = scmp.lt.u32.totalorder %s890_s19, %s940_s3 }
 0x137   : > { %p692_p2 = scmp.lt.u32.totalorder %s690_s4, %s686_s27  ;;  %p694_p8 = scmp.lt.u32.totalorder %s686_s27, %s890_s19 }
 0x138   : > { %p688_p9 = pnand %p687_p7, %p952_p10 }
 0x139   : > { %p693_p4 = por %p692_p2, %p691_p0 }
 0x13a   : > { %p689_p12 = pneg %p688_p9 }
 0x13b   : > { %p695_p11 = por %p694_p8, %p693_p4 }
 0x13d   : > { %p696_p13 = pnand %p695_p11, %p689_p12 }
 0x13f   : > { %699 = shalt.err (!%p696_p13)
}
 0x140   : > { %580 = dma.vmem_to_hbm [thread:$0]  (%p952_p10), %s892_s10, 128, %s890_s19, %s373_s21  }
 0x141 PF: > { %p592_p1 = scmp.ge.s32.totalorder %s754_s17, 2  ;;  %s399_s7 = sand.u32 1, %s734_s12  }
 0x142   : > { %p953_p3 = scmp.ne.s32.totalorder %s946_s24, 0  ;;  %s400_s8 = scalar_lea.sflag [#allocation5], %s399_s7 }
 0x144   : > { %p587_p5 = pnand %p592_p1, %p953_p3 }
 0x146   : > { %729 = dma.done.wait (!%p587_p5), %s400_s8, 128  }
 0x147   : > { %731 = vsyncadd (!%p587_p5), %s400_s8, 4294967168  ;;  %s17_s17 = sadd.s32 1, %s754_s17   ;;  %s954_s12 = smov %s738_s13 }
 0x148   : > { %p14_p6 = scmp.ge.s32.totalorder %s17_s17, 4   ;;  %s955_s13 = smov %s742_s14 }
 0x149   : > { %s956_s14 = smov %s833_s25  ;;  %s957_s15 = smov %s750_s16 }
 0x14a   : > { %s958_s16 = smov %s960_s20  ;;  %16 = sbr.rel (!%p14_p6) target bundleno = 5 (0x5), region = 84 }
 0x151   :  { %405 = vsyncpa [#allocation4], 1 }
 0x152   :  { %407 = vsyncpa [#allocation4 + $0x1], 1 }
 0x153   :  { %408 = vsyncpa [#allocation5], 1 }
 0x154   :  { %410 = vsyncpa [#allocation5 + $0x1], 1 }

</bundles_post_ra>
